<compile_context>
chip_gen: v5e
topology: v5e:2x2
jax: 0.10.0
libtpu: 0.0.40
codegen_flags: <defaults>
</compile_context>

<pallas_src>
import functools

import jax
import jax.numpy as jnp
from jax.experimental import pallas as pl
from jax.experimental.pallas import tpu as pltpu

LANE = 128  # TPU lane width: pad channel-like dims to a multiple of this.


def _round_up(v, m):
    return (v + m - 1) // m * m


# -----------------------------------------------------------------------------
# Fused kernel (one grid step == TB images):
#   single im2col matmul (K = 9*Cin) + bias + ReLU
#   -> f32 global average pool (VPU/XLU reduction)
#   -> linear classifier + bias.
# -----------------------------------------------------------------------------
def _fused_conv_pool_fc_kernel(xp_ref, cw_ref, cb_ref, fw_ref, fb_ref, o_ref,
                               *, tb, hw):
    # xp_ref : (tb*hw, K)       bf16  im2col patches for TB images
    # cw_ref : (K, Cmid_p)      bf16  conv weights, tap-major rows
    # cb_ref : (1, Cmid_p)      f32   conv bias
    # fw_ref : (Cmid_p, Nc_p)   bf16  classifier weights
    # fb_ref : (1, Nc_p)        f32   classifier bias
    # o_ref  : (tb, Nc_p)       f32   logits (padded)

    # Conv as ONE MXU matmul (single push chain, f32 accumulation in MRB/MRF).
    feat = jnp.dot(xp_ref[...], cw_ref[...],
                   preferred_element_type=jnp.float32)            # (tb*hw, Cmid_p)
    feat = jnp.maximum(feat + cb_ref[...], 0.0)

    # Global average pool: stays in f32 on the VPU/XLU (no M=1 f32 MXU matmul).
    cmid_p = feat.shape[-1]
    pooled = jnp.mean(feat.reshape(tb, hw, cmid_p), axis=1)       # (tb, Cmid_p) f32

    # Classifier head fused in the same kernel (no HBM round trip of feat).
    logits = jnp.dot(pooled.astype(jnp.bfloat16), fw_ref[...],
                     preferred_element_type=jnp.float32) + fb_ref[...]
    o_ref[...] = logits                                           # lane-dense store


# -----------------------------------------------------------------------------
# Wrapper: layout plumbing in plain JAX + single pallas_call.
# -----------------------------------------------------------------------------
def _choose_batch_tile(batch, hw, k, cmid_p):
    # Per-image per-step VMEM: double-buffered bf16 patch slab + f32 feature map.
    per_img = hw * (2 * k * 2 + cmid_p * 4)
    tb = max(1, (8 * 1024 * 1024) // per_img)     # ~8 MiB budget for the slab
    tb = min(tb, batch)
    if batch >= 2:
        tb = min(tb, -(-batch // 2))              # keep >=2 grid steps (v7x megacore)
    return tb


def model_forward(params, x_nchw):
    # TODO(synk): conv config hard-coded to 3x3 / stride 1 / pad 1 (matches the
    # synthetic wrapped classifier); other conv configs need a different im2col.
    B, Cin, H, W = x_nchw.shape
    Cmid = params["conv_w"].shape[-1]
    Nc = params["fc_w"].shape[-1]
    cmid_p = _round_up(Cmid, LANE)
    nc_p = _round_up(Nc, LANE)
    hw = H * W
    K = 9 * Cin

    # ---- Host-side im2col to (B, hw, 9*Cin) bf16.  Tiny at these shapes and it
    # presents one lane-dense matmul operand instead of nine 4-wide slices.
    x_nhwc = jnp.transpose(x_nchw, (0, 2, 3, 1)).astype(jnp.bfloat16)
    xpad = jnp.pad(x_nhwc, ((0, 0), (1, 1), (1, 1), (0, 0)))      # conv zero pad = 1
    patches = jnp.concatenate(
        [xpad[:, dy:dy + H, dx:dx + W, :] for dy in range(3) for dx in range(3)],
        axis=-1).reshape(B, hw, K)                                # tap-major columns

    tb = _choose_batch_tile(B, hw, K, cmid_p)
    nb = -(-B // tb)
    b_pad = nb * tb
    if b_pad != B:
        patches = jnp.pad(patches, ((0, b_pad - B), (0, 0), (0, 0)))
    patches = patches.reshape(nb, tb * hw, K)

    # ---- Weights: bf16 operands, f32 biases, channel dims zero-padded to 128.
    cw_p = jnp.pad(params["conv_w"].astype(jnp.bfloat16).reshape(K, Cmid),
                   ((0, 0), (0, cmid_p - Cmid)))
    cb_p = jnp.pad(params["conv_b"].astype(jnp.float32),
                   (0, cmid_p - Cmid)).reshape(1, cmid_p)
    fw_p = jnp.pad(params["fc_w"].astype(jnp.bfloat16),
                   ((0, cmid_p - Cmid), (0, nc_p - Nc)))
    fb_p = jnp.pad(params["fc_b"].astype(jnp.float32),
                   (0, nc_p - Nc)).reshape(1, nc_p)

    cost = pl.CostEstimate(
        flops=2 * b_pad * hw * K * cmid_p          # conv matmul
              + b_pad * hw * cmid_p                # pooling reduction
              + 2 * b_pad * cmid_p * nc_p,         # classifier matmul
        transcendentals=0,
        bytes_accessed=int(patches.size) * 2 + int(cw_p.size) * 2 + int(fw_p.size) * 2
                       + int(cb_p.size) * 4 + int(fb_p.size) * 4 + b_pad * nc_p * 4,
    )

    kernel = functools.partial(_fused_conv_pool_fc_kernel, tb=tb, hw=hw)
    out = pl.pallas_call(
        kernel,
        out_shape=jax.ShapeDtypeStruct((nb, tb, nc_p), jnp.float32),
        grid=(nb,),
        in_specs=[
            pl.BlockSpec((None, tb * hw, K), lambda b: (b, 0, 0)),   # per-step patch slab
            pl.BlockSpec((K, cmid_p), lambda b: (0, 0)),             # constant operands
            pl.BlockSpec((1, cmid_p), lambda b: (0, 0)),
            pl.BlockSpec((cmid_p, nc_p), lambda b: (0, 0)),
            pl.BlockSpec((1, nc_p), lambda b: (0, 0)),
        ],
        out_specs=pl.BlockSpec((None, tb, nc_p), lambda b: (b, 0, 0)),
        compiler_params=pltpu.CompilerParams(
            dimension_semantics=("parallel",),     # shards batch tiles across v7x TCs
        ),
        cost_estimate=cost,
    )(patches, cw_p, cb_p, fw_p, fb_p)

    return out.reshape(b_pad, nc_p)[:B, :Nc]                      # (B, N_classes)


# -----------------------------------------------------------------------------
# Defense wrapper semantics + params.
# -----------------------------------------------------------------------------
def init_params(cin, cmid, n_classes, key):
    k1, k2, k3, k4 = jax.random.split(key, 4)
    conv_w = 0.1 * jax.random.normal(k1, (3, 3, cin, cmid), jnp.float32)
    conv_b = 0.1 * jax.random.normal(k2, (cmid,), jnp.float32)
    fc_w = 0.1 * jax.random.normal(k3, (cmid, n_classes), jnp.float32)
    fc_b = 0.1 * jax.random.normal(k4, (n_classes,), jnp.float32)
    return dict(conv_w=conv_w, conv_b=conv_b, fc_w=fc_w, fc_b=fc_b)


@functools.partial(jax.jit, static_argnums=(2,))
def defense_forward(params, x, use_defense=False):
    # Mirrors Defense.forward: both branches call the same wrapped model.
    if not use_defense:
        return model_forward(params, x)
    else:
        # get_defense_prediction_function(x) == self.model(x)
        return model_forward(params, x)


# -----------------------------------------------------------------------------
# Pure-JAX reference mirroring the kernel's bf16-operand / f32-accumulate math.
# -----------------------------------------------------------------------------
def _model_forward_ref(params, x_nchw):
    x = jnp.transpose(x_nchw, (0, 2, 3, 1)).astype(jnp.bfloat16).astype(jnp.float32)
    B, H, W, Cin = x.shape
    cw = params["conv_w"].astype(jnp.bfloat16).astype(jnp.float32)  # (3,3,Cin,Cmid)
    xp = jnp.pad(x, ((0, 0), (1, 1), (1, 1), (0, 0)))
    acc = jnp.zeros((B, H, W, cw.shape[-1]), jnp.float32)
    for dy in range(3):
        for dx in range(3):
            acc = acc + jnp.einsum("bhwc,cm->bhwm",
                                   xp[:, dy:dy + H, dx:dx + W, :], cw[dy, dx],
                                   precision=jax.lax.Precision.HIGHEST)
    feat = jnp.maximum(acc + params["conv_b"].astype(jnp.float32), 0.0)
    pooled = jnp.mean(feat, axis=(1, 2))
    pooled = pooled.astype(jnp.bfloat16).astype(jnp.float32)
    fw = params["fc_w"].astype(jnp.bfloat16).astype(jnp.float32)
    return jnp.dot(pooled, fw, precision=jax.lax.Precision.HIGHEST) + params["fc_b"]


# -----------------------------------------------------------------------------
if __name__ == "__main__":
    B, Cin, H, W = 2, 4, 16, 16
    Cmid, N_CLASSES = 32, 10

    key = jax.random.PRNGKey(0)
    kx, kp = jax.random.split(key)
    x = jax.random.normal(kx, (B, Cin, H, W), jnp.float32)
    params = init_params(Cin, Cmid, N_CLASSES, kp)

    logits_plain = defense_forward(params, x, False)
    logits_defended = defense_forward(params, x, True)
    jax.block_until_ready((logits_plain, logits_defended))

    assert logits_plain.shape == (B, N_CLASSES)
    # Both Defense branches call the same model -> identical outputs.
    assert jnp.allclose(logits_plain, logits_defended)

    # Numerical check against the pure-JAX reference.
    ref = _model_forward_ref(params, x)
    err = float(jnp.max(jnp.abs(logits_plain - ref)))
    assert err < 1e-2, f"max abs error vs reference: {err}"

    print("KERNEL_OK")
</pallas_src>

<mosaic_0001>
module attributes {stable_mosaic.version = 11 : i64} {
  func.func @_fused_conv_pool_fc_kernel(%arg0: i32, %arg1: memref<1x256x36xbf16, #tpu.memory_space<vmem>>, %arg2: memref<36x128xbf16, #tpu.memory_space<vmem>>, %arg3: memref<1x128xf32, #tpu.memory_space<vmem>>, %arg4: memref<128x128xbf16, #tpu.memory_space<vmem>>, %arg5: memref<1x128xf32, #tpu.memory_space<vmem>>, %arg6: memref<1x1x128xf32, #tpu.memory_space<vmem>>) attributes {dimension_semantics = [#tpu.dimension_semantics<parallel>], iteration_bounds = array<i64: 2>, scalar_prefetch = 0 : i64, scratch_operands = 0 : i64, tpu.core_type = #tpu.core_type<tc>, window_params = [{transform_indices = @transform_0, window_bounds = array<i64: 1, 256, 36>}, {pipeline_mode = #tpu.pipeline_mode<synchronous>, transform_indices = @transform_1, window_bounds = array<i64: 36, 128>}, {pipeline_mode = #tpu.pipeline_mode<synchronous>, transform_indices = @transform_2, window_bounds = array<i64: 1, 128>}, {pipeline_mode = #tpu.pipeline_mode<synchronous>, transform_indices = @transform_3, window_bounds = array<i64: 128, 128>}, {pipeline_mode = #tpu.pipeline_mode<synchronous>, transform_indices = @transform_4, window_bounds = array<i64: 1, 128>}, {transform_indices = @transform_5, window_bounds = array<i64: 1, 1, 128>}]} {
    %c0 = arith.constant 0 : index
    %c0_0 = arith.constant 0 : index
    %c0_1 = arith.constant 0 : index
    %0 = vector.load %arg1[%c0, %c0_0, %c0_1] : memref<1x256x36xbf16, #tpu.memory_space<vmem>>, vector<1x256x36xbf16>
    %1 = vector.shape_cast %0 : vector<1x256x36xbf16> to vector<256x36xbf16>
    %c0_2 = arith.constant 0 : index
    %c0_3 = arith.constant 0 : index
    %2 = vector.load %arg2[%c0_2, %c0_3] : memref<36x128xbf16, #tpu.memory_space<vmem>>, vector<36x128xbf16>
    %cst = arith.constant dense<0.000000e+00> : vector<256x128xf32>
    %3 = tpu.matmul %1, %2, %cst {dimension_numbers = #tpu.dot_dimension_numbers<[1], [0], [0], [1], [0, 0, 1, 1], [], []>} : vector<256x36xbf16>, vector<36x128xbf16>, vector<256x128xf32> -> vector<256x128xf32>
    %c0_4 = arith.constant 0 : index
    %c0_5 = arith.constant 0 : index
    %4 = vector.load %arg3[%c0_4, %c0_5] : memref<1x128xf32, #tpu.memory_space<vmem>>, vector<1x128xf32>
    %5 = vector.broadcast %4 : vector<1x128xf32> to vector<256x128xf32>
    %6 = arith.addf %3, %5 : vector<256x128xf32>
    %cst_6 = arith.constant 0.000000e+00 : f32
    %7 = vector.broadcast %cst_6 : f32 to vector<256x128xf32>
    %8 = arith.maximumf %6, %7 : vector<256x128xf32>
    %9 = vector.shape_cast %8 : vector<256x128xf32> to vector<1x256x128xf32>
    %cst_7 = arith.constant dense<0.000000e+00> : vector<1x128xf32>
    %10 = vector.multi_reduction <add>, %9, %cst_7 [1] : vector<1x256x128xf32> to vector<1x128xf32>
    %cst_8 = arith.constant 2.560000e+02 : f32
    %11 = vector.broadcast %cst_8 : f32 to vector<1x128xf32>
    %12 = arith.divf %10, %11 : vector<1x128xf32>
    %13 = arith.truncf %12 : vector<1x128xf32> to vector<1x128xbf16>
    %c0_9 = arith.constant 0 : index
    %c0_10 = arith.constant 0 : index
    %14 = vector.load %arg4[%c0_9, %c0_10] : memref<128x128xbf16, #tpu.memory_space<vmem>>, vector<128x128xbf16>
    %cst_11 = arith.constant dense<0.000000e+00> : vector<1x128xf32>
    %15 = tpu.matmul %13, %14, %cst_11 {dimension_numbers = #tpu.dot_dimension_numbers<[1], [0], [0], [1], [0, 0, 1, 1], [], []>} : vector<1x128xbf16>, vector<128x128xbf16>, vector<1x128xf32> -> vector<1x128xf32>
    %c0_12 = arith.constant 0 : index
    %c0_13 = arith.constant 0 : index
    %16 = vector.load %arg5[%c0_12, %c0_13] : memref<1x128xf32, #tpu.memory_space<vmem>>, vector<1x128xf32>
    %17 = arith.addf %15, %16 : vector<1x128xf32>
    %c0_14 = arith.constant 0 : index
    %c0_15 = arith.constant 0 : index
    %c0_16 = arith.constant 0 : index
    %18 = vector.load %arg6[%c0_14, %c0_15, %c0_16] : memref<1x1x128xf32, #tpu.memory_space<vmem>>, vector<1x1x128xf32>
    %19 = vector.shape_cast %18 : vector<1x1x128xf32> to vector<1x128xf32>
    %20 = vector.shape_cast %17 : vector<1x128xf32> to vector<1x1x128xf32>
    tpu.vector_store %arg6[%c0_14, %c0_15, %c0_16], %20 {strides = array<i32>} : memref<1x1x128xf32, #tpu.memory_space<vmem>>, vector<1x1x128xf32>,
    return
  }
  func.func @transform_0(%arg0: i32) -> (i32, i32, i32) {
    %c0_i32 = arith.constant 0 : i32
    %c0_i32_0 = arith.constant 0 : i32
    %c0_i32_1 = arith.constant 0 : i32
    return %arg0, %c0_i32, %c0_i32_0 : i32, i32, i32
  }
  func.func @transform_1(%arg0: i32) -> (i32, i32) {
    %c0_i32 = arith.constant 0 : i32
    %c0_i32_0 = arith.constant 0 : i32
    %c0_i32_1 = arith.constant 0 : i32
    return %c0_i32, %c0_i32_0 : i32, i32
  }
  func.func @transform_2(%arg0: i32) -> (i32, i32) {
    %c0_i32 = arith.constant 0 : i32
    %c0_i32_0 = arith.constant 0 : i32
    %c0_i32_1 = arith.constant 0 : i32
    return %c0_i32, %c0_i32_0 : i32, i32
  }
  func.func @transform_3(%arg0: i32) -> (i32, i32) {
    %c0_i32 = arith.constant 0 : i32
    %c0_i32_0 = arith.constant 0 : i32
    %c0_i32_1 = arith.constant 0 : i32
    return %c0_i32, %c0_i32_0 : i32, i32
  }
  func.func @transform_4(%arg0: i32) -> (i32, i32) {
    %c0_i32 = arith.constant 0 : i32
    %c0_i32_0 = arith.constant 0 : i32
    %c0_i32_1 = arith.constant 0 : i32
    return %c0_i32, %c0_i32_0 : i32, i32
  }
  func.func @transform_5(%arg0: i32) -> (i32, i32, i32) {
    %c0_i32 = arith.constant 0 : i32
    %c0_i32_0 = arith.constant 0 : i32
    %c0_i32_1 = arith.constant 0 : i32
    return %arg0, %c0_i32, %c0_i32_0 : i32, i32, i32
  }
}

</mosaic_0001>

<bundles_post_ra>
// kernel: defense_forward.1
= control target key start
LH: loop header
LB: loop body
LE: loop exit
PB: predicated region body
PF: predicated region fallthrough
CT: control target
= control target key end

     0   :  { %10 = vsyncpa [#allocation3], 0  ;;  %s1241_s0 = inlined_call_operand.vmem [shape: bf16[2,256,36], index: 0, kind: input, shape index: {}]   ;;  %s1242_s1 = inlined_call_operand.vmem [shape: bf16[36,128], index: 1, kind: input, shape index: {}]   ;;  %s1243_s2 = inlined_call_operand.vmem [shape: f32[1,128], index: 2, kind: input, shape index: {}]   ;;  %s1244_s3 = inlined_call_operand.vmem [shape: bf16[128,128], index: 3, kind: input, shape index: {}]   ;;  %s1245_s4 = inlined_call_operand.vmem [shape: f32[1,128], index: 4, kind: input, shape index: {}]   ;;  %s1246_s5 = inlined_call_operand.hbm [shape: f32[2,1,128], index: 5, kind: output, shape index: {}]  }
   0x1   :  { %12 = vsyncpa [#allocation3 + $0x1], 0  ;;  %s1025_s18 = smov 0   ;;  %s1027_s19 = smov 0  }
   0x2   :  { %s1029_s20 = smov 0   ;;  %s1031_s21 = smov 0  }
   0x3 LB: > { %s1046_s22 = sadd.s32 4294967295, %s992_s21   ;;  %s726_s23 = sadd.s32 4294967294, %s992_s21   ;;  %s992_s21 = sphi %s1031_s21, %s1252_s21   ;;  %s988_s20 = sphi %s1029_s20, %s1251_s20   ;;  %s984_s19 = sphi %s1027_s19, %s1250_s19   ;;  %s980_s18 = sphi %s1025_s18, %s1249_s18  }
   0x4   : > { %s1050_s24 = sadd.s32 1, %s992_s21   ;;  %s135_s25 = sadd.s32 1, %s988_s20 }
   0x5   : > { %s132_s26 = ssub.s32 %s992_s21, %s1050_s24  ;;  %p145_p0 = scmp.ne.s32.totalorder %s988_s20, %s984_s19 }
   0x6   : > { %p133_p1 = scmp.eq.s32.totalorder %s132_s26, 0  ;;  %p146_p2 = scmp.eq.s32.totalorder %s1046_s22, 1 }
   0x7   : > { %p151_p3 = scmp.ne.s32.totalorder %s984_s19, %s980_s18  ;;  %p152_p4 = scmp.eq.s32.totalorder %s726_s23, 1 }
   0x8   : > { %s1061_s27 = scalar_select %p133_p1, %s988_s20, %s135_s25  }
   0x9   : > { %p1063_p5 = por %p146_p2, %p145_p0  ;;  %p1067_p6 = por %p152_p4, %p151_p3 }
   0xa   : > { %p729_p7 = scmp.ge.s32.totalorder %s992_s21, 1  ;;  %p190_p8 = scmp.lt.s32.totalorder %s992_s21, 3 }
   0xc   : > { %p191_p9 = pnand %p729_p7, %p190_p8 }
   0xd   : > { %p217_p10 = scmp.lt.s32.totalorder (!%p191_p9), %s1046_s22, 1  ;;  %s215_s23 = sand.u32 (!%p191_p9), 1, %s984_s19  }
   0xe   : > { %194 = sbr.rel (%p191_p9) target bundleno = 434 (0x1b2), region = 40  ;;  %s667_s30 = scalar_lea.hbm (!%p191_p9), %s1246_s5, %s1046_s22 }
   0xf   : > { %s216_s8 = scalar_lea.vmem (!%p191_p9), [#allocation2], %s215_s23  ;;  %s659_s11 = scalar_lea.sflag (!%p191_p9), [#allocation3], %s215_s23 }
  0x10   : > { %s669_s9 = sshll.u32 (!%p191_p9), %s216_s8, 4  ;;  %s670_s9 = int_to_ptr.vmem [resolvable:$true] %s669_s9 }
  0x13   : > { %v259_v0 = vld [vmem:[%s1242_s1 + $0x10] sm:$0x3]  ;;  %vm408_vm0 = vcmask 1041408   ;;  %s218_s7 = scalar_select %p217_p10, %s1046_s22, 1  ;;  %v872_v4 = vld [vmem:[%s1242_s1 + $0x8] sm:$0xff]  ;;  %v871_v5 = vld [vmem:[%s1242_s1] sm:$0xff] }
  0x14   : > { %v353_v1 = vunpack.c.l.b16 %v259_v0  ;;  %vm359_vm1 = vcmask 293888   ;;  %v1134_v40 = vld [vmem:[%s1243_s2] ss:$0 sm:$0xff] }
  0x15   : > { %s854_s10 = sshll.u32 %s218_s7, 7 }
  0x16   : > { %v356_v2 = vpack.c.b16 %v353_v1, %v353_v1  ;;  %s1087_s15 = scalar_lea.vmem %s1241_s0, %s854_s10  ;;  %s671_s10 = sshll.u32 %s667_s30, 4  ;;  %s672_s10 = int_to_ptr.hbm [resolvable:$true] %s671_s10 }
  0x17   : > { %v855_v6 = vld [vmem:[%s1087_s15] sm:$0xff]  ;;  %v860_v7 = vld [vmem:[%s1087_s15 + $0x28] sm:$0xff]  ;;  %v865_v8 = vld [vmem:[%s1087_s15 + $0x50] sm:$0xff]  ;;  %s944_s12 = sshra.s32 %s672_s10, 4  ;;  %s945_s12 = int_to_ptr.hbm [resolvable:$true] %s944_s12 }
  0x18   : > { %v410_v3 = vsel %vm408_vm0, %v356_v2, 0  ;;  %v856_v9 = vld [vmem:[%s1087_s15 + $0x8] sm:$0xff]  ;;  %v861_v10 = vld [vmem:[%s1087_s15 + $0x30] sm:$0xff]  ;;  %v866_v11 = vld [vmem:[%s1087_s15 + $0x58] sm:$0xff]  ;;  %s946_s13 = scalar_lea.hbm %s945_s12, 1  ;;  %p951_p0 = scmp.lt.s32.totalorder %s945_s12, %s1246_s5 }
  0x19   : > { %417 = vmatpush.bf16.msra.mxu0 %v410_v3  ;;  %881 = vmatpush.bf16.msra.mxu2 %v410_v3  ;;  %v857_v12 = vld [vmem:[%s1087_s15 + $0x10] sm:$0xff]  ;;  %v862_v13 = vld [vmem:[%s1087_s15 + $0x38] sm:$0xff]  ;;  %v867_v14 = vld [vmem:[%s1087_s15 + $0x60] sm:$0xff]  ;;  %p947_p11 = scmp.ne.s32.totalorder %s945_s12, %s946_s13 }
  0x1a   : > { %882 = vmatpush.bf16.msra.mxu3 %v410_v3  ;;  %v858_v15 = vld [vmem:[%s1087_s15 + $0x18] sm:$0xff]  ;;  %v863_v16 = vld [vmem:[%s1087_s15 + $0x40] sm:$0xff]  ;;  %v868_v17 = vld [vmem:[%s1087_s15 + $0x68] sm:$0xff] }
  0x1b   : > { %v859_v18 = vld [vmem:[%s1087_s15 + $0x20] sm:$0xff]  ;;  %v864_v19 = vld [vmem:[%s1087_s15 + $0x48] sm:$0xff]  ;;  %v869_v20 = vld [vmem:[%s1087_s15 + $0x70] sm:$0xff]  ;;  %p948_p12 = pnand %p947_p11, %p1063_p5 }
  0x1c   : > { %v870_v21 = vld [vmem:[%s1087_s15 + $0x78] sm:$0xff]  ;;  %s950_s15 = scalar_lea.hbm %s1246_s5, 2 }
  0x1d   : > { %418 = vmatpush.bf16.msra.mxu0 %v872_v4  ;;  %883 = vmatpush.bf16.msra.mxu2 %v872_v4  ;;  %p949_p13 = pneg %p948_p12  ;;  %p952_p1 = scmp.lt.s32.totalorder %s950_s15, %s946_s13 }
  0x1e   : > { %884 = vmatpush.bf16.msra.mxu3 %v872_v4 }
  0x1f   : > { %p953_p2 = por %p952_p1, %p951_p0 }
  0x21   : > { %419 = vmatpush.bf16.msra.mxu0 %v871_v5  ;;  %885 = vmatpush.bf16.msra.mxu2 %v871_v5  ;;  %p954_p3 = pnand %p953_p2, %p949_p13 }
  0x22   : > { %886 = vmatpush.bf16.msra.mxu3 %v871_v5 }
  0x24   : > { %804 = vmatmul.msk.bf16.vlgmr.msra.gmra.mxu0 %vm359_vm1, %v855_v6  ;;  %809 = vmatmul.msk.bf16.vlgmr.msra.gmra.mxu2 %vm359_vm1, %v860_v7 }
  0x25   : > { %814 = vmatmul.msk.bf16.vlgmr.msra.gmra.mxu3 %vm359_vm1, %v865_v8 }
  0x34   : > { %805 = vmatmul.msk.bf16.gmra.mxu0 %vm359_vm1, %v856_v9  ;;  %810 = vmatmul.msk.bf16.gmra.mxu2 %vm359_vm1, %v861_v10 }
  0x35   : > { %815 = vmatmul.msk.bf16.gmra.mxu3 %vm359_vm1, %v866_v11 }
  0x44   : > { %806 = vmatmul.msk.bf16.gmra.mxu0 %vm359_vm1, %v857_v12  ;;  %811 = vmatmul.msk.bf16.gmra.mxu2 %vm359_vm1, %v862_v13  ;;  %v880_v12 = vld [vmem:[%s1244_s3 + $0x38] sm:$0xff] }
  0x45   : > { %816 = vmatmul.msk.bf16.gmra.mxu3 %vm359_vm1, %v867_v14  ;;  %644 = vmatpush.bf16.msra.mxu1 %v880_v12 }
  0x54   : > { %807 = vmatmul.msk.bf16.gmra.mxu0 %vm359_vm1, %v858_v15  ;;  %812 = vmatmul.msk.bf16.gmra.mxu2 %vm359_vm1, %v863_v16 }
  0x55   : > { %817 = vmatmul.msk.bf16.gmra.mxu3 %vm359_vm1, %v868_v17 }
  0x64   : > { %808 = vmatmul.msk.bf16.gmra.mxu0 %vm359_vm1, %v859_v18  ;;  %813 = vmatmul.msk.bf16.gmra.mxu2 %vm359_vm1, %v864_v19 }
  0x65   : > { %818 = vmatmul.msk.bf16.gmra.mxu3 %vm359_vm1, %v869_v20  ;;  %v879_v20 = vld [vmem:[%s1244_s3 + $0x30] sm:$0xff] }
  0x66   : > { %645 = vmatpush.bf16.msra.mxu1 %v879_v20 }
  0x75   : > { %819 = vmatmul.msk.bf16.gmra.mxu3 %vm359_vm1, %v870_v21 }
  0xa1   : > { %v421_v22 = vpop.f32.mrf.mxu0 }
  0xa2   : > { %v422_v43 = vadd.f32 %v1134_v40, %v421_v22 }
  0xa4   : > { %v501_v49 = vmax.f32 %v422_v43, 0.0 }
  0xa7   : > { %v446_v23 = vpop.f32.mrf.mxu2 }
  0xa8   : > { %v1121_v24 = vpop.f32.mrf.mxu3  ;;  %v447_v9 = vadd.f32 %v1134_v40, %v446_v23 }
  0xa9   : > { %v423_v25 = vpop.f32.mrf.mxu0 }
  0xaa   : > { %v424_v42 = vadd.f32 %v1134_v40, %v423_v25  ;;  %v511_v16 = vmax.f32 %v447_v9, 0.0 }
  0xac   : > { %v502_v46 = vmax.f32 %v424_v42, 0.0 }
  0xae   : > { %v533_v52 = vadd.f32 %v502_v46, %v501_v49 }
  0xaf   : > { %v448_v26 = vpop.f32.mrf.mxu2 }
  0xb0   : > { %v1123_v27 = vpop.f32.mrf.mxu3  ;;  %v449_v13 = vadd.f32 %v1134_v40, %v448_v26 }
  0xb1   : > { %v426_v28 = vpop.f32.mrf.mxu0 }
  0xb2   : > { %v427_v44 = vadd.f32 %v1134_v40, %v426_v28  ;;  %v512_v21 = vmax.f32 %v449_v13, 0.0 }
  0xb4   : > { %v503_v50 = vmax.f32 %v427_v44, 0.0  ;;  %v877_v44 = vld [vmem:[%s1244_s3 + $0x20] sm:$0xff] }
  0xb6   : > { %v534_v56 = vadd.f32 %v533_v52, %v503_v50 }
  0xb7   : > { %v451_v29 = vpop.f32.mrf.mxu2 }
  0xb8   : > { %v1125_v30 = vpop.f32.mrf.mxu3  ;;  %v452_v17 = vadd.f32 %v1134_v40, %v451_v29  ;;  %v878_v29 = vld [vmem:[%s1244_s3 + $0x28] sm:$0xff] }
  0xb9   : > { %v428_v31 = vpop.f32.mrf.mxu0  ;;  %646 = vmatpush.bf16.msra.mxu1 %v878_v29 }
  0xba   : > { %v429_v47 = vadd.f32 %v1134_v40, %v428_v31  ;;  %v513_v25 = vmax.f32 %v452_v17, 0.0  ;;  %v994_v17 = vmov 256.0  }
  0xbb   : > { %928 = vrcp.f32 %v994_v17 }
  0xbc   : > { %v504_v53 = vmax.f32 %v429_v47, 0.0 }
  0xbd   : > { %647 = vmatpush.bf16.msra.mxu1 %v877_v44 }
  0xbe   : > { %v535_v60 = vadd.f32 %v534_v56, %v504_v53  ;;  %v472_v56 = vadd.f32 %v1134_v40, %v1121_v24  ;;  %v477_v24 = vadd.f32 %v1134_v40, %v1125_v30 }
  0xbf   : > { %v453_v32 = vpop.f32.mrf.mxu2 }
  0xc0   : > { %v1127_v34 = vpop.f32.mrf.mxu3  ;;  %v454_v22 = vadd.f32 %v1134_v40, %v453_v32 }
  0xc1   : > { %v431_v33 = vpop.f32.mrf.mxu0 }
  0xc2   : > { %v432_v51 = vadd.f32 %v1134_v40, %v431_v33  ;;  %v514_v33 = vmax.f32 %v454_v22, 0.0 }
  0xc4   : > { %v505_v57 = vmax.f32 %v432_v51, 0.0  ;;  %v876_v51 = vld [vmem:[%s1244_s3 + $0x18] sm:$0xff] }
  0xc5   : > { %648 = vmatpush.bf16.msra.mxu1 %v876_v51 }
  0xc6   : > { %v536_v63 = vadd.f32 %v535_v60, %v505_v57  ;;  %v474_v60 = vadd.f32 %v1134_v40, %v1123_v27  ;;  %v873_v27 = vld [vmem:[%s1244_s3] sm:$0xff] }
  0xc7   : > { %v456_v35 = vpop.f32.mrf.mxu2 }
  0xc8   : > { %v1129_v37 = vpop.f32.mrf.mxu3  ;;  %v457_v26 = vadd.f32 %v1134_v40, %v456_v35 }
  0xc9   : > { %v433_v36 = vpop.f32.mrf.mxu0 }
  0xca   : > { %v434_v54 = vadd.f32 %v1134_v40, %v433_v36  ;;  %v515_v42 = vmax.f32 %v457_v26, 0.0 }
  0xcc   : > { %v506_v61 = vmax.f32 %v434_v54, 0.0 }
  0xce   : > { %v537_v3 = vadd.f32 %v536_v63, %v506_v61  ;;  %v874_v63 = vld [vmem:[%s1244_s3 + $0x8] sm:$0xff] }
  0xcf   : > { %v458_v39 = vpop.f32.mrf.mxu2 }
  0xd0   : > { %v1136_v41 = vpop.f32.mrf.mxu3  ;;  %v459_v36 = vadd.f32 %v1134_v40, %v458_v39 }
  0xd1   : > { %v436_v38 = vpop.f32.mrf.mxu0  ;;  %v484_v30 = vadd.f32 %v1134_v40, %v1136_v41 }
  0xd2   : > { %v437_v58 = vadd.f32 %v1134_v40, %v436_v38  ;;  %v516_v35 = vmax.f32 %v459_v36, 0.0 }
  0xd4   : > { %v507_v0 = vmax.f32 %v437_v58, 0.0 }
  0xd6   : > { %v538_v5 = vadd.f32 %v537_v3, %v507_v0  ;;  %v521_v0 = vmax.f32 %v472_v56, 0.0  ;;  %v479_v3 = vadd.f32 %v1134_v40, %v1127_v34 }
  0xd7   : > { %v461_v48 = vpop.f32.mrf.mxu2 }
  0xd8   : > { %v1144_v55 = vpop.f32.mrf.mxu3  ;;  %v462_v43 = vadd.f32 %v1134_v40, %v461_v48 }
  0xd9   : > { %v438_v45 = vpop.f32.mrf.mxu0  ;;  %v487_v34 = vadd.f32 %v1134_v40, %v1144_v55 }
  0xda   : > { %v439_v62 = vadd.f32 %v1134_v40, %v438_v45  ;;  %v517_v49 = vmax.f32 %v462_v43, 0.0 }
  0xdc   : > { %v508_v4 = vmax.f32 %v439_v62, 0.0 }
  0xde   : > { %v539_v10 = vadd.f32 %v538_v5, %v508_v4  ;;  %v523_v5 = vmax.f32 %v477_v24, 0.0 }
  0xdf   : > { %v463_v2 = vpop.f32.mrf.mxu2 }
  0xe0   : > { %v1149_v8 = vpop.f32.mrf.mxu3  ;;  %v464_v45 = vadd.f32 %v1134_v40, %v463_v2  ;;  %v522_v2 = vmax.f32 %v474_v60, 0.0 }
  0xe1   : > { %v441_v59 = vpop.f32.mrf.mxu0 }
  0xe2   : > { %v442_v1 = vadd.f32 %v1134_v40, %v441_v59  ;;  %v518_v48 = vmax.f32 %v464_v45, 0.0  ;;  %v875_v59 = vld [vmem:[%s1244_s3 + $0x10] sm:$0xff] }
  0xe3   : > { %649 = vmatpush.bf16.msra.mxu1 %v875_v59 }
  0xe4   : > { %v509_v6 = vmax.f32 %v442_v1, 0.0 }
  0xe6   : > { %v540_v14 = vadd.f32 %v539_v10, %v509_v6  ;;  %v482_v6 = vadd.f32 %v1134_v40, %v1129_v37  ;;  %v524_v10 = vmax.f32 %v479_v3, 0.0  ;;  %v527_v37 = vmax.f32 %v487_v34, 0.0 }
  0xe7   : > { %v466_v19 = vpop.f32.mrf.mxu2  ;;  %650 = vmatpush.bf16.msra.mxu1 %v874_v63 }
  0xe8   : > { %v491_v31 = vpop.f32.mrf.mxu3  ;;  %v467_v50 = vadd.f32 %v1134_v40, %v466_v19  ;;  %v525_v12 = vmax.f32 %v482_v6, 0.0 }
  0xe9   : > { %v443_v7 = vpop.f32.mrf.mxu0 }
  0xea   : > { %v444_v11 = vadd.f32 %v1134_v40, %v443_v7  ;;  %v519_v57 = vmax.f32 %v467_v50, 0.0 }
  0xeb   : > { %651 = vmatpush.bf16.msra.mxu1 %v873_v27 }
  0xec   : > { %v510_v15 = vmax.f32 %v444_v11, 0.0 }
  0xee   : > { %v541_v18 = vadd.f32 %v540_v14, %v510_v15  ;;  %v526_v14 = vmax.f32 %v484_v30, 0.0  ;;  %v489_v15 = vadd.f32 %v1134_v40, %v1149_v8 }
  0xef   : > { %v468_v47 = vpop.f32.mrf.mxu2 }
  0xf0   : > { %v542_v23 = vadd.f32 %v541_v18, %v511_v16  ;;  %v469_v53 = vadd.f32 %v1134_v40, %v468_v47  ;;  %v493_v54 = vpop.f32.mrf.mxu3  ;;  %v492_v18 = vadd.f32 %v1134_v40, %v491_v31  ;;  %v528_v20 = vmax.f32 %v489_v15, 0.0 }
  0xf2   : > { %v543_v28 = vadd.f32 %v542_v23, %v512_v21  ;;  %v520_v62 = vmax.f32 %v469_v53, 0.0  ;;  %v494_v21 = vadd.f32 %v1134_v40, %v493_v54  ;;  %v929_v23 = vpop.eup %928 }
  0xf3   : > { %vm575_vm2 = vweird.f32 %v929_v23 }
  0xf4   : > { %v544_v38 = vadd.f32 %v543_v28, %v513_v25  ;;  %v529_v25 = vmax.f32 %v492_v18, 0.0  ;;  %v530_v29 = vmax.f32 %v494_v21, 0.0 }
  0xf6   : > { %v545_v32 = vadd.f32 %v544_v38, %v514_v33  ;;  %v571_v33 = vmul.f32 256.0, %v929_v23 }
  0xf8   : > { %v546_v46 = vadd.f32 %v545_v32, %v515_v42  ;;  %v496_v9 = vpop.f32.mrf.mxu3  ;;  %v572_v43 = vsub.f32 1.0, %v571_v33 }
  0xf9   : > { %v497_v26 = vadd.f32 %v1134_v40, %v496_v9 }
  0xfa   : > { %v547_v39 = vadd.f32 %v546_v46, %v516_v35  ;;  %v573_v35 = vmul.f32 %v929_v23, %v572_v43 }
  0xfb   : > { %v531_v38 = vmax.f32 %v497_v26, 0.0 }
  0xfc   : > { %v548_v52 = vadd.f32 %v547_v39, %v517_v49  ;;  %v574_v47 = vadd.f32 %v929_v23, %v573_v35 }
  0xfe   : > { %v549_v58 = vadd.f32 %v548_v52, %v518_v48  ;;  %v576_v39 = vsel %vm575_vm2, %v929_v23, %v574_v47  ;;  %v595_v52 = vld [vmem:[%s1245_s4] sm:$0x1] }
 0x100   : > { %v550_v61 = vadd.f32 %v549_v58, %v519_v57  ;;  %v498_v22 = vpop.f32.mrf.mxu3 }
 0x101   : > { %v499_v8 = vadd.f32 %v1134_v40, %v498_v22 }
 0x102   : > { %v551_v1 = vadd.f32 %v550_v61, %v520_v62 }
 0x103   : > { %v532_v31 = vmax.f32 %v499_v8, 0.0 }
 0x104   : > { %v552_v4 = vadd.f32 %v551_v1, %v521_v0 }
 0x106   : > { %v553_v7 = vadd.f32 %v552_v4, %v522_v2 }
 0x108   : > { %v554_v11 = vadd.f32 %v553_v7, %v523_v5 }
 0x10a   : > { %v555_v13 = vadd.f32 %v554_v11, %v524_v10 }
 0x10c   : > { %v556_v16 = vadd.f32 %v555_v13, %v525_v12 }
 0x10e   : > { %v557_v19 = vadd.f32 %v556_v16, %v526_v14 }
 0x110   : > { %v558_v41 = vadd.f32 %v557_v19, %v527_v37 }
 0x112   : > { %v559_v55 = vadd.f32 %v558_v41, %v528_v20 }
 0x114   : > { %v560_v28 = vadd.f32 %v559_v55, %v529_v25 }
 0x116   : > { %v561_v36 = vadd.f32 %v560_v28, %v530_v29 }
 0x118   : > { %v562_v42 = vadd.f32 %v561_v36, %v531_v38 }
 0x11a   : > { %v563_v32 = vadd.f32 %v562_v42, %v532_v31 }
 0x11c   : > { %v564_v44 = vrot.slane %v563_v32, 4 }
 0x11e   : > { %v565_v45 = vadd.f32 %v564_v44, %v563_v32 }
 0x120   : > { %v566_v46 = vrot.slane %v565_v45, 2 }
 0x122   : > { %v567_v49 = vadd.f32 %v566_v46, %v565_v45 }
 0x124   : > { %v568_v50 = vrot.slane %v567_v49, 1 }
 0x126   : > { %v569_v51 = vadd.f32 %v568_v50, %v567_v49 }
 0x128   : > { %v577_v40 = vmul.f32 %v576_v39, %v569_v51 }
 0x12a   : > { %v578_v48 = vpack.c.bf16 %v577_v40, %v577_v40 }
 0x12c   : > { %652 = vmatmul.bf16.vlgmr.msra.gmra.mxu1 %v578_v48 }
 0x1a9   : > { %v653_v53 = vpop.f32.mrf.mxu1 }
 0x1aa   : > { %v654_v54 = vadd.f32 %v653_v53, %v595_v52 }
 0x1ac   : > { %657 = vst [vmem:[%s216_s8] sm:$0x1] %v654_v54 }
 0x1ad   : > { %957 = shalt.err (!%p954_p3)
}
 0x1ae   : > { %887 = dma.vmem_to_hbm [thread:$0]  (%p1063_p5), %s670_s9, 16, %s672_s10, %s659_s11  }
 0x1b1   : > { %v655_v56 = vpop.f32.mrf.mxu1 }
 0x1b2 PF: > { %p893_p4 = scmp.ge.s32.totalorder %s992_s21, 2  ;;  %s683_s23 = sand.u32 1, %s980_s18  }
 0x1b3   : > { %s684_s25 = scalar_lea.sflag [#allocation3], %s683_s23 }
 0x1b4   : > { %p890_p7 = pnand %p893_p4, %p1067_p6 }
 0x1b6   : > { %p891_p8 = pneg %p890_p7 }
 0x1b8   : > { %975 = dma.done.wait (%p891_p8), %s684_s25, 16  }
 0x1b9   : > { %977 = vsyncadd (%p891_p8), %s684_s25, 4294967280  ;;  %p15_p9 = scmp.ge.s32.totalorder %s1050_s24, 4   ;;  %s1249_s18 = smov %s984_s19 }
 0x1ba   : > { %s1250_s19 = smov %s988_s20  ;;  %s1251_s20 = smov %s1061_s27 }
 0x1bb   : > { %s1252_s21 = smov %s1050_s24  ;;  %17 = sbr.rel (!%p15_p9) target bundleno = 3 (0x3), region = 75 }
 0x1c0   :  { %689 = vsyncpa [#allocation3], 1 }
 0x1c1   :  { %691 = vsyncpa [#allocation3 + $0x1], 1 }

</bundles_post_ra>
